<compile_context>
chip_gen: v7x
topology: tpu7x:2x2x1
jax: 0.10.0
libtpu: 0.0.40
codegen_flags: <defaults>
</compile_context>

<pallas_src>
import jax
import jax.numpy as jnp
import numpy as np
from jax.experimental import pallas as pl
from jax.experimental.pallas import tpu as pltpu


def particle_predictor_kernel(x_ref, w0_ref, b0_ref, w1_ref, b1_ref,
                              w2_ref, b2_ref, o_ref):
    # layer 0: [tm, D] @ [D, H] -> [tm, H], ReLU
    h = jnp.dot(x_ref[...], w0_ref[...], preferred_element_type=jnp.float32)
    h = jnp.maximum(h + b0_ref[...], 0.0)
    # layer 1: [tm, H] @ [H, H] -> [tm, H], ReLU
    h = jnp.dot(h, w1_ref[...], preferred_element_type=jnp.float32)
    h = jnp.maximum(h + b1_ref[...], 0.0)
    # layer 2: [tm, H] @ [H, O] -> [tm, O]
    out = jnp.dot(h, w2_ref[...], preferred_element_type=jnp.float32) + b2_ref[...]
    o_ref[...] = out.astype(o_ref.dtype)


def _pick_tile(n, target=512):
    """Large tiles amortize per-step overhead; keep >= 2 steps for v7x megacore."""
    tm = target
    while tm > 8 and pl.cdiv(n, tm) < 2:
        tm //= 2
    return max(tm, 8)


def particle_predictor(x, params, *, tm=None):
    N, D = x.shape
    H = params["w0"].shape[1]
    O = params["w2"].shape[1]

    if tm is None:
        tm = _pick_tile(N)
    grid_m = pl.cdiv(N, tm)
    n_pad = grid_m * tm
    if n_pad != N:
        # ragged particle count: zero-pad rows, sliced off after the call
        x = jnp.pad(x, ((0, n_pad - N), (0, 0)))

    full = lambda shape: pl.BlockSpec(shape, lambda i: (0, 0))

    flops = 2 * n_pad * (D * H + H * H + H * O)
    bytes_accessed = 4 * (n_pad * (D + O)
                          + grid_m * (D * H + H * H + H * O + 2 * H + O))

    out = pl.pallas_call(
        particle_predictor_kernel,
        out_shape=jax.ShapeDtypeStruct((n_pad, O), jnp.float32),
        grid_spec=pltpu.PrefetchScalarGridSpec(
            num_scalar_prefetch=0,
            grid=(grid_m,),
            in_specs=[
                pl.BlockSpec((tm, D), lambda i: (i, 0)),   # x tile
                full((D, H)), full((1, H)),                # linear_0 (W^T, b)
                full((H, H)), full((1, H)),                # linear_1
                full((H, O)), full((1, O)),                # linear_2
            ],
            out_specs=pl.BlockSpec((tm, O), lambda i: (i, 0)),
        ),
        compiler_params=pltpu.CompilerParams(
            dimension_semantics=("parallel",)),
        cost_estimate=pl.CostEstimate(
            flops=flops, transcendentals=0, bytes_accessed=bytes_accessed),
    )(x, params["w0"], params["b0"], params["w1"], params["b1"],
      params["w2"], params["b2"])

    return out[:N] if n_pad != N else out


def init_params(key, input_size, hidden_size, output_size):
    """Deterministic synthetic parameters (torch nn.Linear shapes, transposed
    to [in, out] so the kernel uses x @ W directly)."""
    k = jax.random.split(key, 6)
    D, H, O = input_size, hidden_size, output_size
    return {
        "w0": jax.random.uniform(k[0], (D, H), jnp.float32, -0.1, 0.1),
        "b0": jax.random.uniform(k[1], (1, H), jnp.float32, -0.1, 0.1),
        "w1": jax.random.uniform(k[2], (H, H), jnp.float32, -0.1, 0.1),
        "b1": jax.random.uniform(k[3], (1, H), jnp.float32, -0.1, 0.1),
        "w2": jax.random.uniform(k[4], (H, O), jnp.float32, -0.1, 0.1),
        "b2": jax.random.uniform(k[5], (1, O), jnp.float32, -0.1, 0.1),
    }


def particle_predictor_ref(x, p):
    """Pure-JAX reference mirroring the PyTorch forward."""
    h = jnp.maximum(x @ p["w0"] + p["b0"], 0.0)
    h = jnp.maximum(h @ p["w1"] + p["b1"], 0.0)
    return h @ p["w2"] + p["b2"]


if __name__ == "__main__":
    N, D, H, O = 512, 64, 128, 128   # lane-dense hidden/output widths
    key = jax.random.PRNGKey(0)
    kx, kp = jax.random.split(key)

    x = jax.random.normal(kx, (N, D), jnp.float32)
    params = init_params(kp, D, H, O)

    out = particle_predictor(x, params)
    out = jax.block_until_ready(out)

    ref = particle_predictor_ref(x, params)
    np.testing.assert_allclose(np.asarray(out), np.asarray(ref),
                               rtol=1e-5, atol=1e-5)
    print("KERNEL_OK")
</pallas_src>

<mosaic_0001>
module attributes {stable_mosaic.version = 11 : i64} {
  func.func @particle_predictor_kernel(%arg0: i32, %arg1: memref<256x64xf32, #tpu.memory_space<vmem>>, %arg2: memref<64x128xf32, #tpu.memory_space<vmem>>, %arg3: memref<1x128xf32, #tpu.memory_space<vmem>>, %arg4: memref<128x128xf32, #tpu.memory_space<vmem>>, %arg5: memref<1x128xf32, #tpu.memory_space<vmem>>, %arg6: memref<128x128xf32, #tpu.memory_space<vmem>>, %arg7: memref<1x128xf32, #tpu.memory_space<vmem>>, %arg8: memref<256x128xf32, #tpu.memory_space<vmem>>) attributes {dimension_semantics = [#tpu.dimension_semantics<parallel>], iteration_bounds = array<i64: 2>, scalar_prefetch = 0 : i64, scratch_operands = 0 : i64, tpu.core_type = #tpu.core_type<tc>, window_params = [{transform_indices = @transform_0, window_bounds = array<i64: 256, 64>}, {pipeline_mode = #tpu.pipeline_mode<synchronous>, transform_indices = @transform_1, window_bounds = array<i64: 64, 128>}, {pipeline_mode = #tpu.pipeline_mode<synchronous>, transform_indices = @transform_2, window_bounds = array<i64: 1, 128>}, {pipeline_mode = #tpu.pipeline_mode<synchronous>, transform_indices = @transform_3, window_bounds = array<i64: 128, 128>}, {pipeline_mode = #tpu.pipeline_mode<synchronous>, transform_indices = @transform_4, window_bounds = array<i64: 1, 128>}, {pipeline_mode = #tpu.pipeline_mode<synchronous>, transform_indices = @transform_5, window_bounds = array<i64: 128, 128>}, {pipeline_mode = #tpu.pipeline_mode<synchronous>, transform_indices = @transform_6, window_bounds = array<i64: 1, 128>}, {transform_indices = @transform_7, window_bounds = array<i64: 256, 128>}]} {
    %c0 = arith.constant 0 : index
    %c0_0 = arith.constant 0 : index
    %0 = vector.load %arg1[%c0, %c0_0] : memref<256x64xf32, #tpu.memory_space<vmem>>, vector<256x64xf32>
    %c0_1 = arith.constant 0 : index
    %c0_2 = arith.constant 0 : index
    %1 = vector.load %arg2[%c0_1, %c0_2] : memref<64x128xf32, #tpu.memory_space<vmem>>, vector<64x128xf32>
    %cst = arith.constant dense<0.000000e+00> : vector<256x128xf32>
    %2 = tpu.matmul %0, %1, %cst {dimension_numbers = #tpu.dot_dimension_numbers<[1], [0], [0], [1], [0, 0, 1, 1], [], []>} : vector<256x64xf32>, vector<64x128xf32>, vector<256x128xf32> -> vector<256x128xf32>
    %c0_3 = arith.constant 0 : index
    %c0_4 = arith.constant 0 : index
    %3 = vector.load %arg3[%c0_3, %c0_4] : memref<1x128xf32, #tpu.memory_space<vmem>>, vector<1x128xf32>
    %4 = vector.broadcast %3 : vector<1x128xf32> to vector<256x128xf32>
    %5 = arith.addf %2, %4 : vector<256x128xf32>
    %cst_5 = arith.constant 0.000000e+00 : f32
    %6 = vector.broadcast %cst_5 : f32 to vector<256x128xf32>
    %7 = arith.maximumf %5, %6 : vector<256x128xf32>
    %c0_6 = arith.constant 0 : index
    %c0_7 = arith.constant 0 : index
    %8 = vector.load %arg4[%c0_6, %c0_7] : memref<128x128xf32, #tpu.memory_space<vmem>>, vector<128x128xf32>
    %cst_8 = arith.constant dense<0.000000e+00> : vector<256x128xf32>
    %9 = tpu.matmul %7, %8, %cst_8 {dimension_numbers = #tpu.dot_dimension_numbers<[1], [0], [0], [1], [0, 0, 1, 1], [], []>} : vector<256x128xf32>, vector<128x128xf32>, vector<256x128xf32> -> vector<256x128xf32>
    %c0_9 = arith.constant 0 : index
    %c0_10 = arith.constant 0 : index
    %10 = vector.load %arg5[%c0_9, %c0_10] : memref<1x128xf32, #tpu.memory_space<vmem>>, vector<1x128xf32>
    %11 = vector.broadcast %10 : vector<1x128xf32> to vector<256x128xf32>
    %12 = arith.addf %9, %11 : vector<256x128xf32>
    %cst_11 = arith.constant 0.000000e+00 : f32
    %13 = vector.broadcast %cst_11 : f32 to vector<256x128xf32>
    %14 = arith.maximumf %12, %13 : vector<256x128xf32>
    %c0_12 = arith.constant 0 : index
    %c0_13 = arith.constant 0 : index
    %15 = vector.load %arg6[%c0_12, %c0_13] : memref<128x128xf32, #tpu.memory_space<vmem>>, vector<128x128xf32>
    %cst_14 = arith.constant dense<0.000000e+00> : vector<256x128xf32>
    %16 = tpu.matmul %14, %15, %cst_14 {dimension_numbers = #tpu.dot_dimension_numbers<[1], [0], [0], [1], [0, 0, 1, 1], [], []>} : vector<256x128xf32>, vector<128x128xf32>, vector<256x128xf32> -> vector<256x128xf32>
    %c0_15 = arith.constant 0 : index
    %c0_16 = arith.constant 0 : index
    %17 = vector.load %arg7[%c0_15, %c0_16] : memref<1x128xf32, #tpu.memory_space<vmem>>, vector<1x128xf32>
    %18 = vector.broadcast %17 : vector<1x128xf32> to vector<256x128xf32>
    %19 = arith.addf %16, %18 : vector<256x128xf32>
    %c0_17 = arith.constant 0 : index
    %c0_18 = arith.constant 0 : index
    %20 = vector.load %arg8[%c0_17, %c0_18] : memref<256x128xf32, #tpu.memory_space<vmem>>, vector<256x128xf32>
    tpu.vector_store %arg8[%c0_17, %c0_18], %19 {strides = array<i32>} : memref<256x128xf32, #tpu.memory_space<vmem>>, vector<256x128xf32>,
    return
  }
  func.func @transform_0(%arg0: i32) -> (i32, i32) {
    %c0_i32 = arith.constant 0 : i32
    %c0_i32_0 = arith.constant 0 : i32
    return %arg0, %c0_i32 : i32, i32
  }
  func.func @transform_1(%arg0: i32) -> (i32, i32) {
    %c0_i32 = arith.constant 0 : i32
    %c0_i32_0 = arith.constant 0 : i32
    %c0_i32_1 = arith.constant 0 : i32
    return %c0_i32, %c0_i32_0 : i32, i32
  }
  func.func @transform_2(%arg0: i32) -> (i32, i32) {
    %c0_i32 = arith.constant 0 : i32
    %c0_i32_0 = arith.constant 0 : i32
    %c0_i32_1 = arith.constant 0 : i32
    return %c0_i32, %c0_i32_0 : i32, i32
  }
  func.func @transform_3(%arg0: i32) -> (i32, i32) {
    %c0_i32 = arith.constant 0 : i32
    %c0_i32_0 = arith.constant 0 : i32
    %c0_i32_1 = arith.constant 0 : i32
    return %c0_i32, %c0_i32_0 : i32, i32
  }
  func.func @transform_4(%arg0: i32) -> (i32, i32) {
    %c0_i32 = arith.constant 0 : i32
    %c0_i32_0 = arith.constant 0 : i32
    %c0_i32_1 = arith.constant 0 : i32
    return %c0_i32, %c0_i32_0 : i32, i32
  }
  func.func @transform_5(%arg0: i32) -> (i32, i32) {
    %c0_i32 = arith.constant 0 : i32
    %c0_i32_0 = arith.constant 0 : i32
    %c0_i32_1 = arith.constant 0 : i32
    return %c0_i32, %c0_i32_0 : i32, i32
  }
  func.func @transform_6(%arg0: i32) -> (i32, i32) {
    %c0_i32 = arith.constant 0 : i32
    %c0_i32_0 = arith.constant 0 : i32
    %c0_i32_1 = arith.constant 0 : i32
    return %c0_i32, %c0_i32_0 : i32, i32
  }
  func.func @transform_7(%arg0: i32) -> (i32, i32) {
    %c0_i32 = arith.constant 0 : i32
    %c0_i32_0 = arith.constant 0 : i32
    return %arg0, %c0_i32 : i32, i32
  }
}

</mosaic_0001>

<bundles_post_ra>
// kernel: tpu_custom_call.1
= control target key start
LH: loop header
LB: loop body
LE: loop exit
PB: predicated region body
PF: predicated region fallthrough
CT: control target
= control target key end

     0   :  { %12 = vsyncpa [#allocation3], 0  ;;  %s2420_s0 = inlined_call_operand.vmem [shape: f32[512,64], index: 0, kind: input, shape index: {}]   ;;  %s2421_s1 = inlined_call_operand.vmem [shape: f32[64,128], index: 1, kind: input, shape index: {}]   ;;  %s2422_s2 = inlined_call_operand.vmem [shape: f32[1,128], index: 2, kind: input, shape index: {}]   ;;  %s2423_s3 = inlined_call_operand.vmem [shape: f32[128,128], index: 3, kind: input, shape index: {}]   ;;  %s2424_s4 = inlined_call_operand.vmem [shape: f32[1,128], index: 4, kind: input, shape index: {}]   ;;  %s2425_s5 = inlined_call_operand.vmem [shape: f32[128,128], index: 5, kind: input, shape index: {}]   ;;  %s2426_s6 = inlined_call_operand.vmem [shape: f32[1,128], index: 6, kind: input, shape index: {}]   ;;  %s2427_s7 = inlined_call_operand.hbm [shape: f32[512,128], index: 7, kind: output, shape index: {}]  }
   0x1   :  { %14 = vsyncpa [#allocation3 + $0x1], 0  ;;  %s1961_s24 = smov 0   ;;  %s1963_s25 = smov 0  }
   0x2   :  { %s1965_s26 = smov 0   ;;  %s1967_s27 = smov 0  }
   0x3 LB: > { %s1982_s28 = sadd.s32 4294967295, %s1916_s27   ;;  %s1317_s29 = sadd.s32 4294967294, %s1916_s27   ;;  %s1916_s27 = sphi %s1967_s27, %s2433_s27   ;;  %s1912_s26 = sphi %s1965_s26, %s2432_s26   ;;  %s1908_s25 = sphi %s1963_s25, %s2431_s25   ;;  %s1904_s24 = sphi %s1961_s24, %s2430_s24  }
   0x4   : > { %s1986_s30 = sadd.s32 1, %s1916_s27   ;;  %s179_s8 = sadd.s32 1, %s1912_s26 }
   0x5   : > { %s176_s9 = ssub.s32 %s1916_s27, %s1986_s30  ;;  %p189_p0 = scmp.ne.s32.totalorder %s1912_s26, %s1908_s25 }
   0x6   : > { %p177_p1 = scmp.eq.s32.totalorder %s176_s9, 0  ;;  %p190_p2 = scmp.eq.s32.totalorder %s1982_s28, 1 }
   0x7   : > { %p195_p3 = scmp.ne.s32.totalorder %s1908_s25, %s1904_s24  ;;  %p196_p4 = scmp.eq.s32.totalorder %s1317_s29, 1 }
   0x8   : > { %s1997_s10 = scalar_select %p177_p1, %s1912_s26, %s179_s8  }
   0x9   : > { %p1999_p5 = por %p190_p2, %p189_p0  ;;  %p2003_p6 = por %p196_p4, %p195_p3 }
   0xa   : > { %p1320_p7 = scmp.ge.s32.totalorder %s1916_s27, 1  ;;  %p241_p8 = scmp.lt.s32.totalorder %s1916_s27, 3 }
   0xc   : > { %p242_p9 = pnand %p1320_p7, %p241_p8 }
   0xd   : > { %v312_v0 = vld [vmem:[%s2421_s1] sm:$0xff] (!%p242_p9)  ;;  %v313_v1 = vld [vmem:[%s2421_s1 + $0x8] sm:$0xff] (!%p242_p9)  ;;  %v314_v2 = vld [vmem:[%s2421_s1 + $0x10] sm:$0xff] (!%p242_p9)  ;;  %s1322_s19 = sshll.u32 (!%p242_p9), %s1982_s28, 5  ;;  %vm327_vm0 = vcmask (!%p242_p9), 523264   ;;  %s1364_s8 = sshll.u32 (!%p242_p9), %s1982_s28, 12 }
   0xe   : > { %245 = sbr.rel (%p242_p9) target bundleno = 758 (0x2f6), region = 48  ;;  %v1725_v3 = vpack.c.bf16 (!%p242_p9), %v313_v1, %v312_v0  ;;  %v315_v4 = vld [vmem:[%s2421_s1 + $0x18] sm:$0xff] (!%p242_p9)  ;;  %p274_p10 = scmp.lt.s32.totalorder (!%p242_p9), %s1322_s19, 63  ;;  %v316_v6 = vld [vmem:[%s2421_s1 + $0x20] sm:$0xff] (!%p242_p9)  ;;  %v317_v7 = vld [vmem:[%s2421_s1 + $0x28] sm:$0xff] (!%p242_p9) }
   0xf   : > { %v1729_v5 = vpack.c.bf16 (!%p242_p9), %v315_v4, %v314_v2  ;;  %v1733_v8 = vpack.c.bf16 (!%p242_p9), %v317_v7, %v316_v6  ;;  %v318_v9 = vld [vmem:[%s2421_s1 + $0x30] sm:$0xff] (!%p242_p9)  ;;  %v319_v10 = vld [vmem:[%s2421_s1 + $0x38] sm:$0xff] (!%p242_p9)  ;;  %v681_v13 = vld [vmem:[%s2423_s3] sm:$0xff] (!%p242_p9)  ;;  %s2370_s14 = scalar_lea.hbm (!%p242_p9), %s2427_s7, %s1364_s8  ;;  %s1918_s16 = smov (!%p242_p9), [#allocation2]  }
  0x10   : > { %1726 = vmatprep.subr.bf16.mxu0 (!%p242_p9), %v1725_v3  ;;  %1805 = vmatprep.subr.bf16.mxu1 (!%p242_p9), %v1725_v3  ;;  %v1737_v12 = vpack.c.bf16 (!%p242_p9), %v319_v10, %v318_v9  ;;  %v682_v14 = vld [vmem:[%s2423_s3 + $0x8] sm:$0xff] (!%p242_p9)  ;;  %v683_v17 = vld [vmem:[%s2423_s3 + $0x10] sm:$0xff] (!%p242_p9)  ;;  %v684_v18 = vld [vmem:[%s2423_s3 + $0x18] sm:$0xff] (!%p242_p9)  ;;  %s1858_s17 = sshll.u32 (!%p242_p9), %s1918_s16, 4  ;;  %s1859_s17 = int_to_ptr.vmem [resolvable:$false] %s1858_s17 }
  0x11   : > { %1728 = vmatpush3.bf16.msra.mxu0 (!%p242_p9), %v1725_v3  ;;  %1809 = vmatpush3.bf16.msra.mxu1 (!%p242_p9), %v1725_v3  ;;  %v1741_v16 = vpack.c.bf16 (!%p242_p9), %v682_v14, %v681_v13  ;;  %v1745_v23 = vpack.c.bf16 (!%p242_p9), %v684_v18, %v683_v17  ;;  %v685_v24 = vld [vmem:[%s2423_s3 + $0x20] sm:$0xff] (!%p242_p9)  ;;  %v686_v25 = vld [vmem:[%s2423_s3 + $0x28] sm:$0xff] (!%p242_p9)  ;;  %v687_v31 = vld [vmem:[%s2423_s3 + $0x30] sm:$0xff] (!%p242_p9)  ;;  %s1860_s18 = scalar_lea.vmem (!%p242_p9), %s1859_s17, 8192 }
  0x12   : > { %1730 = vmatprep.subr.bf16.mxu0 (!%p242_p9), %v1729_v5  ;;  %1806 = vmatprep.subr.bf16.mxu1 (!%p242_p9), %v1729_v5  ;;  %v1749_v30 = vpack.c.bf16 (!%p242_p9), %v686_v25, %v685_v24  ;;  %v688_v32 = vld [vmem:[%s2423_s3 + $0x38] sm:$0xff] (!%p242_p9)  ;;  %v689_v38 = vld [vmem:[%s2423_s3 + $0x40] sm:$0xff] (!%p242_p9)  ;;  %v690_v39 = vld [vmem:[%s2423_s3 + $0x48] sm:$0xff] (!%p242_p9) }
  0x13   : > { %v1753_v37 = vpack.c.bf16 (!%p242_p9), %v688_v32, %v687_v31  ;;  %v1757_v44 = vpack.c.bf16 (!%p242_p9), %v690_v39, %v689_v38  ;;  %v691_v45 = vld [vmem:[%s2423_s3 + $0x50] sm:$0xff] (!%p242_p9)  ;;  %v692_v46 = vld [vmem:[%s2423_s3 + $0x58] sm:$0xff] (!%p242_p9)  ;;  %v693_v52 = vld [vmem:[%s2423_s3 + $0x60] sm:$0xff] (!%p242_p9) }
  0x14   : > { %v1761_v51 = vpack.c.bf16 (!%p242_p9), %v692_v46, %v691_v45  ;;  %v694_v53 = vld [vmem:[%s2423_s3 + $0x68] sm:$0xff] (!%p242_p9)  ;;  %v695_v1 = vld [vmem:[%s2423_s3 + $0x70] sm:$0xff] (!%p242_p9)  ;;  %v696_v2 = vld [vmem:[%s2423_s3 + $0x78] sm:$0xff] (!%p242_p9) }
  0x15   : > { %s2435_s19 = smov (!%p274_p10, %s1322_s19), 63  ;;  %1732 = vmatpush3.bf16.msra.mxu0 %v1729_v5  ;;  %1810 = vmatpush3.bf16.msra.mxu1 %v1729_v5  ;;  %v1765_v58 = vpack.c.bf16 %v694_v53, %v693_v52  ;;  %v1769_v3 = vpack.c.bf16 %v696_v2, %v695_v1  ;;  %v961_v4 = vld [vmem:[%s2425_s5] sm:$0xff]  ;;  %v962_v5 = vld [vmem:[%s2425_s5 + $0x8] sm:$0xff]  ;;  %v963_v6 = vld [vmem:[%s2425_s5 + $0x10] sm:$0xff] }
  0x16   : > { %s1323_s9 = sshll.u32 %s2435_s19, 3  ;;  %1734 = vmatprep.subr.bf16.mxu0 %v1733_v8  ;;  %1807 = vmatprep.subr.bf16.mxu1 %v1733_v8  ;;  %v1773_v7 = vpack.c.bf16 %v962_v5, %v961_v4  ;;  %v965_v10 = vld [vmem:[%s2425_s5 + $0x20] sm:$0xff]  ;;  %v967_v13 = vld [vmem:[%s2425_s5 + $0x30] sm:$0xff]  ;;  %v968_v14 = vld [vmem:[%s2425_s5 + $0x38] sm:$0xff]  ;;  %s270_s19 = sand.u32 1, %s1908_s25  }
  0x17   : > { %s2037_s20 = scalar_lea.vmem %s2420_s0, %s1323_s9  ;;  %v970_v17 = vld [vmem:[%s2425_s5 + $0x48] sm:$0xff]  ;;  %v2196_v25 = vld [vmem:[%s2422_s2] ss:$0 sm:$0xff]  ;;  %s1321_s21 = sshll.u32 %s270_s19, 8 }
  0x18   : > { %v280_v11 = vld [vmem:[%s2037_s20] sm:$0xff]  ;;  %v281_v19 = vld [vmem:[%s2037_s20 + $0x8] sm:$0xff]  ;;  %v282_v20 = vld [vmem:[%s2037_s20 + $0x10] sm:$0xff]  ;;  %s2304_s29 = scalar_lea.vmem [#allocation2], %s1321_s21  ;;  %s2379_s28 = scalar_lea.sflag [#allocation3], %s270_s19 }
  0x19   : > { %1517 = vmatprep.mubr.msk.f32.mxu0 %vm327_vm0, %v280_v11  ;;  %1736 = vmatpush3.bf16.msra.mxu0 %v1733_v8  ;;  %v296_v15 = vld [vmem:[%s2037_s20 + $0x80] sm:$0xff]  ;;  %v297_v21 = vld [vmem:[%s2037_s20 + $0x88] sm:$0xff]  ;;  %v298_v22 = vld [vmem:[%s2037_s20 + $0x90] sm:$0xff]  ;;  %s1255_s9 = sshll.u32 %s2304_s29, 4  ;;  %s2372_s9 = int_to_ptr.vmem [resolvable:$true] %s1255_s9 }
  0x1a   : > { %1738 = vmatprep.subr.bf16.mxu0 %v1737_v12  ;;  %1811 = vmatpush3.bf16.msra.mxu1 %v1733_v8  ;;  %v283_v26 = vld [vmem:[%s2037_s20 + $0x18] sm:$0xff]  ;;  %v284_v27 = vld [vmem:[%s2037_s20 + $0x20] sm:$0xff]  ;;  %v285_v33 = vld [vmem:[%s2037_s20 + $0x28] sm:$0xff]  ;;  %s1854_s15 = scalar_lea.vmem %s2372_s9, 4096  ;;  %p1861_p0 = scmp.lt.s32.totalorder %s2372_s9, %s1859_s17 }
  0x1b   : > { %1808 = vmatprep.subr.bf16.mxu1 %v1737_v12  ;;  %1541 = vmatprep.mubr.msk.f32.mxu1 %vm327_vm0, %v296_v15  ;;  %v299_v28 = vld [vmem:[%s2037_s20 + $0x98] sm:$0xff]  ;;  %v300_v29 = vld [vmem:[%s2037_s20 + $0xa0] sm:$0xff]  ;;  %v286_v34 = vld [vmem:[%s2037_s20 + $0x30] sm:$0xff]  ;;  %v1785_v15 = vpack.c.bf16 %v968_v14, %v967_v13  ;;  %p1855_p11 = scmp.ne.s32.totalorder %s2372_s9, %s1854_s15  ;;  %p1862_p1 = scmp.lt.s32.totalorder %s1860_s18, %s1854_s15 }
  0x1c   : > { %v301_v35 = vld [vmem:[%s2037_s20 + $0xa8] sm:$0xff]  ;;  %v302_v36 = vld [vmem:[%s2037_s20 + $0xb0] sm:$0xff]  ;;  %v287_v40 = vld [vmem:[%s2037_s20 + $0x38] sm:$0xff] }
  0x1d   : > { %1740 = vmatpush3.bf16.msra.mxu0 %v1737_v12  ;;  %v288_v41 = vld [vmem:[%s2037_s20 + $0x40] sm:$0xff]  ;;  %v303_v42 = vld [vmem:[%s2037_s20 + $0xb8] sm:$0xff]  ;;  %v289_v47 = vld [vmem:[%s2037_s20 + $0x48] sm:$0xff]  ;;  %p1856_p12 = pnand %p1855_p11, %p1999_p5  ;;  %p1863_p2 = por %p1862_p1, %p1861_p0 }
  0x1e   : > { %1812 = vmatpush3.bf16.msra.mxu1 %v1737_v12  ;;  %v304_v43 = vld [vmem:[%s2037_s20 + $0xc0] sm:$0xff]  ;;  %v290_v48 = vld [vmem:[%s2037_s20 + $0x50] sm:$0xff]  ;;  %v305_v49 = vld [vmem:[%s2037_s20 + $0xc8] sm:$0xff]  ;;  %1774 = vmatprep.subr.bf16.mxu0 %v1773_v7 }
  0x1f   : > { %1742 = vmatprep.subr.bf16.mxu1 %v1741_v16  ;;  %v306_v50 = vld [vmem:[%s2037_s20 + $0xd0] sm:$0xff]  ;;  %v291_v54 = vld [vmem:[%s2037_s20 + $0x58] sm:$0xff]  ;;  %v292_v55 = vld [vmem:[%s2037_s20 + $0x60] sm:$0xff]  ;;  %p1857_p13 = pneg %p1856_p12 }
  0x20   : > { %1518 = vmatmul.mubr.msk.f32.vlgmr.msra.gmra.mrb[0].mxu0 %vm327_vm0, %v281_v19  ;;  %v307_v56 = vld [vmem:[%s2037_s20 + $0xd8] sm:$0xff]  ;;  %v308_v57 = vld [vmem:[%s2037_s20 + $0xe0] sm:$0xff]  ;;  %v293_v59 = vld [vmem:[%s2037_s20 + $0x68] sm:$0xff] }
  0x21   : > { %1520 = vmatprep.mubr.msk.f32.mxu0 %vm327_vm0, %v282_v20  ;;  %1542 = vmatmul.mubr.msk.f32.vlgmr.msra.gmra.mrb[0].mxu1 %vm327_vm0, %v297_v21  ;;  %v294_v60 = vld [vmem:[%s2037_s20 + $0x70] sm:$0xff]  ;;  %v309_v61 = vld [vmem:[%s2037_s20 + $0xe8] sm:$0xff]  ;;  %v295_v63 = vld [vmem:[%s2037_s20 + $0x78] sm:$0xff]  ;;  %p1864_p3 = pnand %p1863_p2, %p1857_p13 }
  0x22   : > { %1544 = vmatprep.mubr.msk.f32.mxu1 %vm327_vm0, %v298_v22  ;;  %1744 = vmatpush3.bf16.msra.mxu1 %v1741_v16  ;;  %v310_v62 = vld [vmem:[%s2037_s20 + $0xf0] sm:$0xff]  ;;  %v311_v0 = vld [vmem:[%s2037_s20 + $0xf8] sm:$0xff]  ;;  %v966_v11 = vld [vmem:[%s2425_s5 + $0x28] sm:$0xff] }
  0x23   : > { %1746 = vmatprep.subr.bf16.mxu1 %v1745_v23  ;;  %v964_v8 = vld [vmem:[%s2425_s5 + $0x18] sm:$0xff]  ;;  %1776 = vmatpush3.bf16.msra.mxu0 %v1773_v7  ;;  %v1781_v12 = vpack.c.bf16 %v966_v11, %v965_v10  ;;  %v969_v16 = vld [vmem:[%s2425_s5 + $0x40] sm:$0xff]  ;;  %v971_v19 = vld [vmem:[%s2425_s5 + $0x50] sm:$0xff] }
  0x24   : > { %1521 = vmatmul.mubr.msk.f32.gmra.mrb[2].mxu0 %vm327_vm0, %v283_v26  ;;  %v1777_v9 = vpack.c.bf16 %v964_v8, %v963_v6  ;;  %v1789_v18 = vpack.c.bf16 %v970_v17, %v969_v16  ;;  %v972_v20 = vld [vmem:[%s2425_s5 + $0x58] sm:$0xff]  ;;  %v973_v22 = vld [vmem:[%s2425_s5 + $0x60] sm:$0xff] }
  0x25   : > { %1523 = vmatprep.mubr.msk.f32.mxu0 %vm327_vm0, %v284_v27  ;;  %1545 = vmatmul.mubr.msk.f32.gmra.mrb[2].mxu1 %vm327_vm0, %v299_v28  ;;  %v1793_v21 = vpack.c.bf16 %v972_v20, %v971_v19 }
  0x26   : > { %1547 = vmatprep.mubr.msk.f32.mxu1 %vm327_vm0, %v300_v29  ;;  %1748 = vmatpush3.bf16.msra.mxu1 %v1745_v23  ;;  %v974_v23 = vld [vmem:[%s2425_s5 + $0x68] sm:$0xff] }
  0x27   : > { %1750 = vmatprep.subr.bf16.mxu1 %v1749_v30  ;;  %1778 = vmatprep.subr.bf16.mxu0 %v1777_v9  ;;  %v1797_v24 = vpack.c.bf16 %v974_v23, %v973_v22 }
  0x28   : > { %1524 = vmatmul.mubr.msk.f32.gmra.mrb[4].mxu0 %vm327_vm0, %v285_v33 }
  0x29   : > { %1526 = vmatprep.mubr.msk.f32.mxu0 %vm327_vm0, %v286_v34  ;;  %1548 = vmatmul.mubr.msk.f32.gmra.mrb[4].mxu1 %vm327_vm0, %v301_v35 }
  0x2a   : > { %1550 = vmatprep.mubr.msk.f32.mxu1 %vm327_vm0, %v302_v36  ;;  %1752 = vmatpush3.bf16.msra.mxu1 %v1749_v30 }
  0x2b   : > { %1754 = vmatprep.subr.bf16.mxu1 %v1753_v37  ;;  %1780 = vmatpush3.bf16.msra.mxu0 %v1777_v9 }
  0x2c   : > { %1527 = vmatmul.mubr.msk.f32.gmra.mrb[6].mxu0 %vm327_vm0, %v287_v40  ;;  %1782 = vmatprep.subr.bf16.mxu0 %v1781_v12 }
  0x2d   : > { %1529 = vmatprep.mubr.msk.f32.mxu0 %vm327_vm0, %v288_v41  ;;  %1551 = vmatmul.mubr.msk.f32.gmra.mrb[6].mxu1 %vm327_vm0, %v303_v42 }
  0x2e   : > { %1553 = vmatprep.mubr.msk.f32.mxu1 %vm327_vm0, %v304_v43  ;;  %1756 = vmatpush3.bf16.msra.mxu1 %v1753_v37 }
  0x2f   : > { %1758 = vmatprep.subr.bf16.mxu1 %v1757_v44  ;;  %1784 = vmatpush3.bf16.msra.mxu0 %v1781_v12 }
  0x30   : > { %1530 = vmatmul.mubr.msk.f32.gmra.mrb[8].mxu0 %vm327_vm0, %v289_v47  ;;  %1786 = vmatprep.subr.bf16.mxu0 %v1785_v15 }
  0x31   : > { %1532 = vmatprep.mubr.msk.f32.mxu0 %vm327_vm0, %v290_v48  ;;  %1554 = vmatmul.mubr.msk.f32.gmra.mrb[8].mxu1 %vm327_vm0, %v305_v49 }
  0x32   : > { %1556 = vmatprep.mubr.msk.f32.mxu1 %vm327_vm0, %v306_v50  ;;  %1760 = vmatpush3.bf16.msra.mxu1 %v1757_v44 }
  0x33   : > { %1762 = vmatprep.subr.bf16.mxu1 %v1761_v51  ;;  %1788 = vmatpush3.bf16.msra.mxu0 %v1785_v15 }
  0x34   : > { %1533 = vmatmul.mubr.msk.f32.gmra.mrb[10].mxu0 %vm327_vm0, %v291_v54  ;;  %1790 = vmatprep.subr.bf16.mxu0 %v1789_v18 }
  0x35   : > { %1535 = vmatprep.mubr.msk.f32.mxu0 %vm327_vm0, %v292_v55  ;;  %1557 = vmatmul.mubr.msk.f32.gmra.mrb[10].mxu1 %vm327_vm0, %v307_v56 }
  0x36   : > { %1559 = vmatprep.mubr.msk.f32.mxu1 %vm327_vm0, %v308_v57  ;;  %1764 = vmatpush3.bf16.msra.mxu1 %v1761_v51 }
  0x37   : > { %1766 = vmatprep.subr.bf16.mxu1 %v1765_v58  ;;  %1792 = vmatpush3.bf16.msra.mxu0 %v1789_v18 }
  0x38   : > { %1536 = vmatmul.mubr.msk.f32.gmra.mrb[12].mxu0 %vm327_vm0, %v293_v59  ;;  %1794 = vmatprep.subr.bf16.mxu0 %v1793_v21 }
  0x39   : > { %1538 = vmatprep.mubr.msk.f32.mxu0 %vm327_vm0, %v294_v60  ;;  %1560 = vmatmul.mubr.msk.f32.gmra.mrb[12].mxu1 %vm327_vm0, %v309_v61 }
  0x3a   : > { %1562 = vmatprep.mubr.msk.f32.mxu1 %vm327_vm0, %v310_v62  ;;  %1768 = vmatpush3.bf16.msra.mxu1 %v1765_v58 }
  0x3b   : > { %1770 = vmatprep.subr.bf16.mxu1 %v1769_v3  ;;  %1796 = vmatpush3.bf16.msra.mxu0 %v1793_v21 }
  0x3c   : > { %1539 = vmatmul.mubr.msk.f32.gmra.mrb[14].mxu0 %vm327_vm0, %v295_v63  ;;  %1798 = vmatprep.subr.bf16.mxu0 %v1797_v24 }
  0x3d   : > { %1563 = vmatmul.mubr.msk.f32.gmra.mrb[14].mxu1 %vm327_vm0, %v311_v0 }
  0x3e   : > { %1772 = vmatpush3.bf16.msra.mxu1 %v1769_v3 }
  0x3f   : > { %1800 = vmatpush3.bf16.msra.mxu0 %v1797_v24 }
  0xf3   : > { %v1519_v26 = vpop.f32.mrb[0].mxu0 }
  0xf4   : > { %v496_v27 = vadd.f32 %v1519_v26, %v2196_v25  ;;  %v490_v28 = vpop.f32.mrb[1].mxu0  ;;  %v2199_v29 = vpop.f32.mrb[0].mxu1 }
  0xf5   : > { %v491_v30 = vadd.f32 %v2196_v25, %v490_v28  ;;  %v2202_v31 = vpop.f32.mrb[1].mxu1 }
  0xf6   : > { %v650_v34 = vmax.f32 %v496_v27, 0.0  ;;  %v571_v18 = vadd.f32 %v2196_v25, %v2202_v31 }
  0xf7   : > { %v649_v32 = vmax.f32 %v491_v30, 0.0  ;;  %v1522_v33 = vpop.f32.mrb[2].mxu0 }
  0xf8   : > { %v506_v35 = vadd.f32 %v1522_v33, %v2196_v25  ;;  %v500_v36 = vpop.f32.mrb[3].mxu0  ;;  %v2205_v37 = vpop.f32.mrb[2].mxu1  ;;  %v665_v27 = vmax.f32 %v571_v18, 0.0 }
  0xf9   : > { %v501_v38 = vadd.f32 %v2196_v25, %v500_v36  ;;  %1597 = vmatprep.mubr.f32.mxu1 %v649_v32  ;;  %v2208_v39 = vpop.f32.mrb[3].mxu1  ;;  %v576_v32 = vadd.f32 %v2199_v29, %v2196_v25 }
  0xfa   : > { %1598 = vmatmul.mubr.f32.vlgmr.msra.gmra.mrb[16].mxu1 %v650_v34  ;;  %v652_v42 = vmax.f32 %v506_v35, 0.0  ;;  %v581_v28 = vadd.f32 %v2196_v25, %v2208_v39  ;;  %v586_v35 = vadd.f32 %v2205_v37, %v2196_v25 }
  0xfb   : > { %v651_v40 = vmax.f32 %v501_v38, 0.0  ;;  %v1525_v41 = vpop.f32.mrb[4].mxu0  ;;  %v666_v34 = vmax.f32 %v576_v32, 0.0 }
  0xfc   : > { %v516_v43 = vadd.f32 %v1525_v41, %v2196_v25  ;;  %v510_v44 = vpop.f32.mrb[5].mxu0  ;;  %v2211_v45 = vpop.f32.mrb[4].mxu1  ;;  %v667_v31 = vmax.f32 %v581_v28, 0.0  ;;  %v668_v39 = vmax.f32 %v586_v35, 0.0 }
  0xfd   : > { %v511_v46 = vadd.f32 %v2196_v25, %v510_v44  ;;  %1600 = vmatprep.mubr.f32.mxu1 %v651_v40  ;;  %v590_v47 = vpop.f32.mrb[5].mxu1  ;;  %v596_v40 = vadd.f32 %v2211_v45, %v2196_v25 }
  0xfe   : > { %1601 = vmatmul.mubr.f32.gmra.mrb[18].mxu1 %v652_v42  ;;  %v654_v50 = vmax.f32 %v516_v43, 0.0  ;;  %v591_v33 = vadd.f32 %v2196_v25, %v590_v47 }
  0xff   : > { %v653_v48 = vmax.f32 %v511_v46, 0.0  ;;  %v1528_v49 = vpop.f32.mrb[6].mxu0  ;;  %v670_v42 = vmax.f32 %v596_v40, 0.0 }
 0x100   : > { %v526_v51 = vadd.f32 %v1528_v49, %v2196_v25  ;;  %v520_v52 = vpop.f32.mrb[7].mxu0  ;;  %v2215_v53 = vpop.f32.mrb[6].mxu1  ;;  %v669_v36 = vmax.f32 %v591_v33, 0.0 }
 0x101   : > { %v521_v54 = vadd.f32 %v2196_v25, %v520_v52  ;;  %1603 = vmatprep.mubr.f32.mxu1 %v653_v48  ;;  %v600_v55 = vpop.f32.mrb[7].mxu1  ;;  %v606_v43 = vadd.f32 %v2215_v53, %v2196_v25 }
 0x102   : > { %1604 = vmatmul.mubr.f32.gmra.mrb[20].mxu1 %v654_v50  ;;  %v656_v58 = vmax.f32 %v526_v51, 0.0  ;;  %v601_v38 = vadd.f32 %v2196_v25, %v600_v55 }
 0x103   : > { %v655_v56 = vmax.f32 %v521_v54, 0.0  ;;  %v1531_v57 = vpop.f32.mrb[8].mxu0  ;;  %v672_v46 = vmax.f32 %v606_v43, 0.0 }
 0x104   : > { %v536_v59 = vadd.f32 %v1531_v57, %v2196_v25  ;;  %v530_v60 = vpop.f32.mrb[9].mxu0  ;;  %v2219_v61 = vpop.f32.mrb[8].mxu1  ;;  %v671_v29 = vmax.f32 %v601_v38, 0.0 }
 0x105   : > { %v531_v62 = vadd.f32 %v2196_v25, %v530_v60  ;;  %1606 = vmatprep.mubr.f32.mxu1 %v655_v56  ;;  %v610_v63 = vpop.f32.mrb[9].mxu1  ;;  %v616_v47 = vadd.f32 %v2219_v61, %v2196_v25  ;;  %v976_v60 = vld [vmem:[%s2425_s5 + $0x78] sm:$0xff] }
 0x106   : > { %1607 = vmatmul.mubr.f32.gmra.mrb[22].mxu1 %v656_v58  ;;  %v658_v2 = vmax.f32 %v536_v59, 0.0  ;;  %v611_v41 = vadd.f32 %v2196_v25, %v610_v63  ;;  %v975_v59 = vld [vmem:[%s2425_s5 + $0x70] sm:$0xff] }
 0x107   : > { %v657_v0 = vmax.f32 %v531_v62, 0.0  ;;  %v1534_v1 = vpop.f32.mrb[10].mxu0  ;;  %v674_v49 = vmax.f32 %v616_v47, 0.0  ;;  %v1801_v61 = vpack.c.bf16 %v976_v60, %v975_v59  ;;  %v2260_v62 = vld [vmem:[%s2424_s4] ss:$0 sm:$0xff] }
 0x108   : > { %v546_v3 = vadd.f32 %v1534_v1, %v2196_v25  ;;  %v540_v4 = vpop.f32.mrb[11].mxu0  ;;  %v1558_v5 = vpop.f32.mrb[10].mxu1  ;;  %v673_v37 = vmax.f32 %v611_v41, 0.0 }
 0x109   : > { %v541_v6 = vadd.f32 %v2196_v25, %v540_v4  ;;  %1609 = vmatprep.mubr.f32.mxu1 %v657_v0  ;;  %v620_v7 = vpop.f32.mrb[11].mxu1  ;;  %v626_v50 = vadd.f32 %v1558_v5, %v2196_v25  ;;  %1802 = vmatprep.subr.bf16.mxu0 %v1801_v61 }
 0x10a   : > { %1610 = vmatmul.mubr.f32.gmra.mrb[24].mxu1 %v658_v2  ;;  %v660_v10 = vmax.f32 %v546_v3, 0.0  ;;  %v621_v44 = vadd.f32 %v2196_v25, %v620_v7  ;;  %1804 = vmatpush3.bf16.msra.mxu0 %v1801_v61 }
 0x10b   : > { %v659_v8 = vmax.f32 %v541_v6, 0.0  ;;  %v1537_v9 = vpop.f32.mrb[12].mxu0  ;;  %v676_v53 = vmax.f32 %v626_v50, 0.0 }
 0x10c   : > { %v556_v11 = vadd.f32 %v1537_v9, %v2196_v25  ;;  %v550_v12 = vpop.f32.mrb[13].mxu0  ;;  %v1561_v13 = vpop.f32.mrb[12].mxu1  ;;  %v675_v45 = vmax.f32 %v621_v44, 0.0 }
 0x10d   : > { %v551_v14 = vadd.f32 %v2196_v25, %v550_v12  ;;  %1612 = vmatprep.mubr.f32.mxu1 %v659_v8  ;;  %v630_v15 = vpop.f32.mrb[13].mxu1  ;;  %v636_v54 = vadd.f32 %v1561_v13, %v2196_v25 }
 0x10e   : > { %1613 = vmatmul.mubr.f32.gmra.mrb[26].mxu1 %v660_v10  ;;  %v662_v19 = vmax.f32 %v556_v11, 0.0  ;;  %v631_v48 = vadd.f32 %v2196_v25, %v630_v15 }
 0x10f   : > { %v661_v16 = vmax.f32 %v551_v14, 0.0  ;;  %v1540_v17 = vpop.f32.mrb[14].mxu0  ;;  %v678_v56 = vmax.f32 %v636_v54, 0.0 }
 0x110   : > { %v566_v20 = vadd.f32 %v1540_v17, %v2196_v25  ;;  %v560_v21 = vpop.f32.mrb[15].mxu0  ;;  %v1564_v22 = vpop.f32.mrb[14].mxu1  ;;  %v677_v51 = vmax.f32 %v631_v48, 0.0 }
 0x111   : > { %v561_v23 = vadd.f32 %v2196_v25, %v560_v21  ;;  %1615 = vmatprep.mubr.f32.mxu1 %v661_v16  ;;  %v640_v24 = vpop.f32.mrb[15].mxu1  ;;  %v646_v57 = vadd.f32 %v1564_v22, %v2196_v25 }
 0x112   : > { %1616 = vmatmul.mubr.f32.gmra.mrb[28].mxu1 %v662_v19  ;;  %v664_v30 = vmax.f32 %v566_v20, 0.0  ;;  %v641_v52 = vadd.f32 %v2196_v25, %v640_v24 }
 0x113   : > { %v663_v26 = vmax.f32 %v561_v23, 0.0  ;;  %v680_v58 = vmax.f32 %v646_v57, 0.0 }
 0x114   : > { %v679_v55 = vmax.f32 %v641_v52, 0.0 }
 0x115   : > { %1618 = vmatprep.mubr.f32.mxu1 %v663_v26 }
 0x116   : > { %1619 = vmatmul.mubr.f32.gmra.mrb[30].mxu1 %v664_v30 }
 0x117   : > { %1621 = vmatprep.mubr.f32.mxu1 %v665_v27 }
 0x11a   : > { %1622 = vmatmul.mubr.f32.gmra.mrb[32].mxu1 %v666_v34 }
 0x11b   : > { %1624 = vmatprep.mubr.f32.mxu1 %v667_v31 }
 0x11e   : > { %1625 = vmatmul.mubr.f32.gmra.mrb[34].mxu1 %v668_v39 }
 0x11f   : > { %1627 = vmatprep.mubr.f32.mxu1 %v669_v36 }
 0x122   : > { %1628 = vmatmul.mubr.f32.gmra.mrb[36].mxu1 %v670_v42 }
 0x123   : > { %1630 = vmatprep.mubr.f32.mxu1 %v671_v29 }
 0x126   : > { %1631 = vmatmul.mubr.f32.gmra.mrb[38].mxu1 %v672_v46 }
 0x127   : > { %1633 = vmatprep.mubr.f32.mxu1 %v673_v37 }
 0x12a   : > { %1634 = vmatmul.mubr.f32.gmra.mrb[40].mxu1 %v674_v49 }
 0x12b   : > { %1636 = vmatprep.mubr.f32.mxu1 %v675_v45 }
 0x12e   : > { %1637 = vmatmul.mubr.f32.gmra.mrb[42].mxu1 %v676_v53 }
 0x12f   : > { %1639 = vmatprep.mubr.f32.mxu1 %v677_v51 }
 0x132   : > { %1640 = vmatmul.mubr.f32.gmra.mrb[44].mxu1 %v678_v56 }
 0x133   : > { %1642 = vmatprep.mubr.f32.mxu1 %v679_v55 }
 0x136   : > { %1643 = vmatmul.mubr.f32.gmra.mrb[46].mxu1 %v680_v58 }
 0x1cd   : > { %v1599_v25 = vpop.f32.mrb[16].mxu1 }
 0x1ce   : > { %v776_v63 = vadd.f32 %v1599_v25, %v2260_v62  ;;  %v770_v0 = vpop.f32.mrb[17].mxu1 }
 0x1cf   : > { %v771_v1 = vadd.f32 %v2260_v62, %v770_v0 }
 0x1d0   : > { %v930_v4 = vmax.f32 %v776_v63, 0.0 }
 0x1d1   : > { %v929_v2 = vmax.f32 %v771_v1, 0.0  ;;  %v1602_v3 = vpop.f32.mrb[18].mxu1 }
 0x1d2   : > { %v786_v5 = vadd.f32 %v1602_v3, %v2260_v62  ;;  %v780_v6 = vpop.f32.mrb[19].mxu1 }
 0x1d3   : > { %v781_v7 = vadd.f32 %v2260_v62, %v780_v6  ;;  %1677 = vmatprep.mubr.f32.mxu0 %v929_v2 }
 0x1d4   : > { %1678 = vmatmul.mubr.f32.vlgmr.msra.gmra.mrb[16].mxu0 %v930_v4  ;;  %v932_v10 = vmax.f32 %v786_v5, 0.0 }
 0x1d5   : > { %v931_v8 = vmax.f32 %v781_v7, 0.0  ;;  %v1605_v9 = vpop.f32.mrb[20].mxu1 }
 0x1d6   : > { %v796_v11 = vadd.f32 %v1605_v9, %v2260_v62  ;;  %v790_v12 = vpop.f32.mrb[21].mxu1 }
 0x1d7   : > { %v791_v13 = vadd.f32 %v2260_v62, %v790_v12  ;;  %1680 = vmatprep.mubr.f32.mxu0 %v931_v8 }
 0x1d8   : > { %1681 = vmatmul.mubr.f32.gmra.mrb[18].mxu0 %v932_v10  ;;  %v934_v16 = vmax.f32 %v796_v11, 0.0 }
 0x1d9   : > { %v933_v14 = vmax.f32 %v791_v13, 0.0  ;;  %v1608_v15 = vpop.f32.mrb[22].mxu1 }
 0x1da   : > { %v806_v17 = vadd.f32 %v1608_v15, %v2260_v62  ;;  %v800_v18 = vpop.f32.mrb[23].mxu1 }
 0x1db   : > { %v801_v19 = vadd.f32 %v2260_v62, %v800_v18  ;;  %1683 = vmatprep.mubr.f32.mxu0 %v933_v14 }
 0x1dc   : > { %1684 = vmatmul.mubr.f32.gmra.mrb[20].mxu0 %v934_v16  ;;  %v936_v22 = vmax.f32 %v806_v17, 0.0 }
 0x1dd   : > { %v935_v20 = vmax.f32 %v801_v19, 0.0  ;;  %v1611_v21 = vpop.f32.mrb[24].mxu1 }
 0x1de   : > { %v816_v23 = vadd.f32 %v1611_v21, %v2260_v62  ;;  %v810_v24 = vpop.f32.mrb[25].mxu1 }
 0x1df   : > { %v811_v26 = vadd.f32 %v2260_v62, %v810_v24  ;;  %1686 = vmatprep.mubr.f32.mxu0 %v935_v20 }
 0x1e0   : > { %1687 = vmatmul.mubr.f32.gmra.mrb[22].mxu0 %v936_v22  ;;  %v938_v30 = vmax.f32 %v816_v23, 0.0 }
 0x1e1   : > { %v937_v27 = vmax.f32 %v811_v26, 0.0  ;;  %v1614_v28 = vpop.f32.mrb[26].mxu1 }
 0x1e2   : > { %v826_v32 = vadd.f32 %v1614_v28, %v2260_v62  ;;  %v820_v31 = vpop.f32.mrb[27].mxu1 }
 0x1e3   : > { %v821_v33 = vadd.f32 %v2260_v62, %v820_v31  ;;  %1689 = vmatprep.mubr.f32.mxu0 %v937_v27 }
 0x1e4   : > { %1690 = vmatmul.mubr.f32.gmra.mrb[24].mxu0 %v938_v30  ;;  %v940_v36 = vmax.f32 %v826_v32, 0.0 }
 0x1e5   : > { %v939_v34 = vmax.f32 %v821_v33, 0.0  ;;  %v1617_v35 = vpop.f32.mrb[28].mxu1  ;;  %v2300_v33 = vld [vmem:[%s2426_s6] ss:$0 sm:$0xff] }
 0x1e6   : > { %v836_v38 = vadd.f32 %v1617_v35, %v2260_v62  ;;  %v830_v39 = vpop.f32.mrb[29].mxu1 }
 0x1e7   : > { %v831_v40 = vadd.f32 %v2260_v62, %v830_v39  ;;  %1692 = vmatprep.mubr.f32.mxu0 %v939_v34 }
 0x1e8   : > { %1693 = vmatmul.mubr.f32.gmra.mrb[26].mxu0 %v940_v36  ;;  %v942_v42 = vmax.f32 %v836_v38, 0.0 }
 0x1e9   : > { %v941_v29 = vmax.f32 %v831_v40, 0.0  ;;  %v1620_v41 = vpop.f32.mrb[30].mxu1 }
 0x1ea   : > { %v846_v43 = vadd.f32 %v1620_v41, %v2260_v62  ;;  %v840_v37 = vpop.f32.mrb[31].mxu1 }
 0x1eb   : > { %v841_v44 = vadd.f32 %v2260_v62, %v840_v37  ;;  %1695 = vmatprep.mubr.f32.mxu0 %v941_v29 }
 0x1ec   : > { %1696 = vmatmul.mubr.f32.gmra.mrb[28].mxu0 %v942_v42  ;;  %v944_v45 = vmax.f32 %v846_v43, 0.0 }
 0x1ed   : > { %v943_v46 = vmax.f32 %v841_v44, 0.0  ;;  %v1623_v47 = vpop.f32.mrb[32].mxu1 }
 0x1ee   : > { %v856_v48 = vadd.f32 %v1623_v47, %v2260_v62  ;;  %v850_v49 = vpop.f32.mrb[33].mxu1 }
 0x1ef   : > { %v851_v50 = vadd.f32 %v2260_v62, %v850_v49  ;;  %1698 = vmatprep.mubr.f32.mxu0 %v943_v46 }
 0x1f0   : > { %1699 = vmatmul.mubr.f32.gmra.mrb[30].mxu0 %v944_v45  ;;  %v946_v53 = vmax.f32 %v856_v48, 0.0 }
 0x1f1   : > { %v945_v51 = vmax.f32 %v851_v50, 0.0  ;;  %v1626_v52 = vpop.f32.mrb[34].mxu1 }
 0x1f2   : > { %v866_v54 = vadd.f32 %v1626_v52, %v2260_v62  ;;  %v860_v55 = vpop.f32.mrb[35].mxu1 }
 0x1f3   : > { %v861_v56 = vadd.f32 %v2260_v62, %v860_v55  ;;  %1701 = vmatprep.mubr.f32.mxu0 %v945_v51 }
 0x1f4   : > { %1702 = vmatmul.mubr.f32.gmra.mrb[32].mxu0 %v946_v53  ;;  %v948_v59 = vmax.f32 %v866_v54, 0.0 }
 0x1f5   : > { %v947_v57 = vmax.f32 %v861_v56, 0.0  ;;  %v1629_v58 = vpop.f32.mrb[36].mxu1 }
 0x1f6   : > { %v876_v60 = vadd.f32 %v1629_v58, %v2260_v62  ;;  %v870_v61 = vpop.f32.mrb[37].mxu1 }
 0x1f7   : > { %v871_v25 = vadd.f32 %v2260_v62, %v870_v61  ;;  %1704 = vmatprep.mubr.f32.mxu0 %v947_v57 }
 0x1f8   : > { %1705 = vmatmul.mubr.f32.gmra.mrb[34].mxu0 %v948_v59  ;;  %v950_v1 = vmax.f32 %v876_v60, 0.0 }
 0x1f9   : > { %v949_v63 = vmax.f32 %v871_v25, 0.0  ;;  %v1632_v0 = vpop.f32.mrb[38].mxu1 }
 0x1fa   : > { %v886_v2 = vadd.f32 %v1632_v0, %v2260_v62  ;;  %v880_v3 = vpop.f32.mrb[39].mxu1 }
 0x1fb   : > { %v881_v4 = vadd.f32 %v2260_v62, %v880_v3  ;;  %1707 = vmatprep.mubr.f32.mxu0 %v949_v63 }
 0x1fc   : > { %1708 = vmatmul.mubr.f32.gmra.mrb[36].mxu0 %v950_v1  ;;  %v952_v7 = vmax.f32 %v886_v2, 0.0 }
 0x1fd   : > { %v951_v5 = vmax.f32 %v881_v4, 0.0  ;;  %v1635_v6 = vpop.f32.mrb[40].mxu1 }
 0x1fe   : > { %v896_v8 = vadd.f32 %v1635_v6, %v2260_v62  ;;  %v890_v9 = vpop.f32.mrb[41].mxu1 }
 0x1ff   : > { %v891_v10 = vadd.f32 %v2260_v62, %v890_v9  ;;  %1710 = vmatprep.mubr.f32.mxu0 %v951_v5 }
 0x200   : > { %1711 = vmatmul.mubr.f32.gmra.mrb[38].mxu0 %v952_v7  ;;  %v954_v13 = vmax.f32 %v896_v8, 0.0 }
 0x201   : > { %v953_v11 = vmax.f32 %v891_v10, 0.0  ;;  %v1638_v12 = vpop.f32.mrb[42].mxu1 }
 0x202   : > { %v906_v14 = vadd.f32 %v1638_v12, %v2260_v62  ;;  %v900_v15 = vpop.f32.mrb[43].mxu1 }
 0x203   : > { %v901_v16 = vadd.f32 %v2260_v62, %v900_v15  ;;  %1713 = vmatprep.mubr.f32.mxu0 %v953_v11 }
 0x204   : > { %1714 = vmatmul.mubr.f32.gmra.mrb[40].mxu0 %v954_v13  ;;  %v956_v19 = vmax.f32 %v906_v14, 0.0 }
 0x205   : > { %v955_v17 = vmax.f32 %v901_v16, 0.0  ;;  %v1641_v18 = vpop.f32.mrb[44].mxu1 }
 0x206   : > { %v916_v20 = vadd.f32 %v1641_v18, %v2260_v62  ;;  %v910_v21 = vpop.f32.mrb[45].mxu1 }
 0x207   : > { %v911_v22 = vadd.f32 %v2260_v62, %v910_v21  ;;  %1716 = vmatprep.mubr.f32.mxu0 %v955_v17 }
 0x208   : > { %1717 = vmatmul.mubr.f32.gmra.mrb[42].mxu0 %v956_v19  ;;  %v958_v26 = vmax.f32 %v916_v20, 0.0 }
 0x209   : > { %v957_v23 = vmax.f32 %v911_v22, 0.0  ;;  %v1644_v24 = vpop.f32.mrb[46].mxu1 }
 0x20a   : > { %v926_v27 = vadd.f32 %v1644_v24, %v2260_v62  ;;  %v920_v28 = vpop.f32.mrb[47].mxu1 }
 0x20b   : > { %v921_v30 = vadd.f32 %v2260_v62, %v920_v28  ;;  %1719 = vmatprep.mubr.f32.mxu0 %v957_v23 }
 0x20c   : > { %1720 = vmatmul.mubr.f32.gmra.mrb[44].mxu0 %v958_v26  ;;  %v960_v31 = vmax.f32 %v926_v27, 0.0 }
 0x20d   : > { %v959_v32 = vmax.f32 %v921_v30, 0.0 }
 0x20f   : > { %1722 = vmatprep.mubr.f32.mxu0 %v959_v32 }
 0x210   : > { %1723 = vmatmul.mubr.f32.gmra.mrb[46].mxu0 %v960_v31 }
 0x2a7   : > { %v1679_v34 = vpop.f32.mrb[16].mxu0 }
 0x2a8   : > { %v1056_v35 = vadd.f32 %v1679_v34, %v2300_v33  ;;  %v1050_v36 = vpop.f32.mrb[17].mxu0 }
 0x2a9   : > { %v1051_v62 = vadd.f32 %v2300_v33, %v1050_v36 }
 0x2aa   : > { %1210 = vst [vmem:[%s2304_s29 + $0x8] sm:$0xff] %v1056_v35 }
 0x2ab   : > { %1209 = vst [vmem:[%s2304_s29] sm:$0xff] %v1051_v62  ;;  %v1682_v38 = vpop.f32.mrb[18].mxu0 }
 0x2ac   : > { %v1066_v39 = vadd.f32 %v1682_v38, %v2300_v33  ;;  %v1060_v40 = vpop.f32.mrb[19].mxu0 }
 0x2ad   : > { %v1061_v29 = vadd.f32 %v2300_v33, %v1060_v40 }
 0x2ae   : > { %1212 = vst [vmem:[%s2304_s29 + $0x18] sm:$0xff] %v1066_v39 }
 0x2af   : > { %1211 = vst [vmem:[%s2304_s29 + $0x10] sm:$0xff] %v1061_v29  ;;  %v1685_v41 = vpop.f32.mrb[20].mxu0 }
 0x2b0   : > { %v1076_v42 = vadd.f32 %v1685_v41, %v2300_v33  ;;  %v1070_v43 = vpop.f32.mrb[21].mxu0 }
 0x2b1   : > { %v1071_v37 = vadd.f32 %v2300_v33, %v1070_v43 }
 0x2b2   : > { %1214 = vst [vmem:[%s2304_s29 + $0x28] sm:$0xff] %v1076_v42 }
 0x2b3   : > { %1213 = vst [vmem:[%s2304_s29 + $0x20] sm:$0xff] %v1071_v37  ;;  %v1688_v44 = vpop.f32.mrb[22].mxu0 }
 0x2b4   : > { %v1086_v46 = vadd.f32 %v1688_v44, %v2300_v33  ;;  %v1080_v47 = vpop.f32.mrb[23].mxu0 }
 0x2b5   : > { %v1081_v45 = vadd.f32 %v2300_v33, %v1080_v47 }
 0x2b6   : > { %1216 = vst [vmem:[%s2304_s29 + $0x38] sm:$0xff] %v1086_v46 }
 0x2b7   : > { %1215 = vst [vmem:[%s2304_s29 + $0x30] sm:$0xff] %v1081_v45  ;;  %v1691_v48 = vpop.f32.mrb[24].mxu0 }
 0x2b8   : > { %v1096_v49 = vadd.f32 %v1691_v48, %v2300_v33  ;;  %v1090_v50 = vpop.f32.mrb[25].mxu0 }
 0x2b9   : > { %v1091_v51 = vadd.f32 %v2300_v33, %v1090_v50 }
 0x2ba   : > { %1218 = vst [vmem:[%s2304_s29 + $0x48] sm:$0xff] %v1096_v49 }
 0x2bb   : > { %1217 = vst [vmem:[%s2304_s29 + $0x40] sm:$0xff] %v1091_v51  ;;  %v1694_v52 = vpop.f32.mrb[26].mxu0 }
 0x2bc   : > { %v1106_v53 = vadd.f32 %v1694_v52, %v2300_v33  ;;  %v1100_v54 = vpop.f32.mrb[27].mxu0 }
 0x2bd   : > { %v1101_v55 = vadd.f32 %v2300_v33, %v1100_v54 }
 0x2be   : > { %1220 = vst [vmem:[%s2304_s29 + $0x58] sm:$0xff] %v1106_v53 }
 0x2bf   : > { %1219 = vst [vmem:[%s2304_s29 + $0x50] sm:$0xff] %v1101_v55  ;;  %v1697_v56 = vpop.f32.mrb[28].mxu0 }
 0x2c0   : > { %v1116_v57 = vadd.f32 %v1697_v56, %v2300_v33  ;;  %v1110_v58 = vpop.f32.mrb[29].mxu0 }
 0x2c1   : > { %v1111_v59 = vadd.f32 %v2300_v33, %v1110_v58 }
 0x2c2   : > { %1222 = vst [vmem:[%s2304_s29 + $0x68] sm:$0xff] %v1116_v57 }
 0x2c3   : > { %1221 = vst [vmem:[%s2304_s29 + $0x60] sm:$0xff] %v1111_v59  ;;  %v1700_v60 = vpop.f32.mrb[30].mxu0 }
 0x2c4   : > { %v1126_v61 = vadd.f32 %v1700_v60, %v2300_v33  ;;  %v1120_v25 = vpop.f32.mrb[31].mxu0 }
 0x2c5   : > { %v1121_v63 = vadd.f32 %v2300_v33, %v1120_v25 }
 0x2c6   : > { %1224 = vst [vmem:[%s2304_s29 + $0x78] sm:$0xff] %v1126_v61 }
 0x2c7   : > { %1223 = vst [vmem:[%s2304_s29 + $0x70] sm:$0xff] %v1121_v63  ;;  %v1703_v0 = vpop.f32.mrb[32].mxu0 }
 0x2c8   : > { %v1136_v1 = vadd.f32 %v1703_v0, %v2300_v33  ;;  %v1130_v2 = vpop.f32.mrb[33].mxu0 }
 0x2c9   : > { %v1131_v3 = vadd.f32 %v2300_v33, %v1130_v2 }
 0x2ca   : > { %1226 = vst [vmem:[%s2304_s29 + $0x88] sm:$0xff] %v1136_v1 }
 0x2cb   : > { %1225 = vst [vmem:[%s2304_s29 + $0x80] sm:$0xff] %v1131_v3  ;;  %v1706_v4 = vpop.f32.mrb[34].mxu0 }
 0x2cc   : > { %v1146_v5 = vadd.f32 %v1706_v4, %v2300_v33  ;;  %v1140_v6 = vpop.f32.mrb[35].mxu0 }
 0x2cd   : > { %v1141_v7 = vadd.f32 %v2300_v33, %v1140_v6 }
 0x2ce   : > { %1228 = vst [vmem:[%s2304_s29 + $0x98] sm:$0xff] %v1146_v5 }
 0x2cf   : > { %1227 = vst [vmem:[%s2304_s29 + $0x90] sm:$0xff] %v1141_v7  ;;  %v1709_v8 = vpop.f32.mrb[36].mxu0 }
 0x2d0   : > { %v1156_v9 = vadd.f32 %v1709_v8, %v2300_v33  ;;  %v1150_v10 = vpop.f32.mrb[37].mxu0 }
 0x2d1   : > { %v1151_v11 = vadd.f32 %v2300_v33, %v1150_v10 }
 0x2d2   : > { %1230 = vst [vmem:[%s2304_s29 + $0xa8] sm:$0xff] %v1156_v9 }
 0x2d3   : > { %1229 = vst [vmem:[%s2304_s29 + $0xa0] sm:$0xff] %v1151_v11  ;;  %v1712_v12 = vpop.f32.mrb[38].mxu0 }
 0x2d4   : > { %v1166_v13 = vadd.f32 %v1712_v12, %v2300_v33  ;;  %v1160_v14 = vpop.f32.mrb[39].mxu0 }
 0x2d5   : > { %v1161_v15 = vadd.f32 %v2300_v33, %v1160_v14 }
 0x2d6   : > { %1232 = vst [vmem:[%s2304_s29 + $0xb8] sm:$0xff] %v1166_v13 }
 0x2d7   : > { %1231 = vst [vmem:[%s2304_s29 + $0xb0] sm:$0xff] %v1161_v15  ;;  %v1715_v16 = vpop.f32.mrb[40].mxu0 }
 0x2d8   : > { %v1176_v17 = vadd.f32 %v1715_v16, %v2300_v33  ;;  %v1170_v18 = vpop.f32.mrb[41].mxu0 }
 0x2d9   : > { %v1171_v19 = vadd.f32 %v2300_v33, %v1170_v18 }
 0x2da   : > { %1234 = vst [vmem:[%s2304_s29 + $0xc8] sm:$0xff] %v1176_v17 }
 0x2db   : > { %1233 = vst [vmem:[%s2304_s29 + $0xc0] sm:$0xff] %v1171_v19  ;;  %v1718_v20 = vpop.f32.mrb[42].mxu0 }
 0x2dc   : > { %v1186_v21 = vadd.f32 %v1718_v20, %v2300_v33  ;;  %v1180_v22 = vpop.f32.mrb[43].mxu0 }
 0x2dd   : > { %v1181_v23 = vadd.f32 %v2300_v33, %v1180_v22 }
 0x2de   : > { %1236 = vst [vmem:[%s2304_s29 + $0xd8] sm:$0xff] %v1186_v21 }
 0x2df   : > { %1235 = vst [vmem:[%s2304_s29 + $0xd0] sm:$0xff] %v1181_v23  ;;  %v1721_v24 = vpop.f32.mrb[44].mxu0 }
 0x2e0   : > { %v1196_v26 = vadd.f32 %v1721_v24, %v2300_v33  ;;  %v1190_v27 = vpop.f32.mrb[45].mxu0 }
 0x2e1   : > { %v1191_v28 = vadd.f32 %v2300_v33, %v1190_v27 }
 0x2e2   : > { %1238 = vst [vmem:[%s2304_s29 + $0xe8] sm:$0xff] %v1196_v26 }
 0x2e3   : > { %1237 = vst [vmem:[%s2304_s29 + $0xe0] sm:$0xff] %v1191_v28  ;;  %v1724_v30 = vpop.f32.mrb[46].mxu0 }
 0x2e4   : > { %v1206_v32 = vadd.f32 %v1724_v30, %v2300_v33  ;;  %v1200_v31 = vpop.f32.mrb[47].mxu0 }
 0x2e5   : > { %v1201_v34 = vadd.f32 %v2300_v33, %v1200_v31 }
 0x2e6   : > { %1240 = vst [vmem:[%s2304_s29 + $0xf8] sm:$0xff] %v1206_v32 }
 0x2e7   : > { %1239 = vst [vmem:[%s2304_s29 + $0xf0] sm:$0xff] %v1201_v34 }
 0x2e8   : > { %1867 = shalt.err (!%p1864_p3)
}
 0x2e9   : > { %s1868_s19 = scalar_lea.hbm %s2370_s14, 4096  ;;  %s1872_s23 = scalar_lea.hbm %s2427_s7, 8192 }
 0x2ea   : > { %p1869_p4 = scmp.ne.s32.totalorder %s2370_s14, %s1868_s19  ;;  %p1873_p9 = scmp.lt.u32.totalorder %s2370_s14, %s2427_s7 }
 0x2eb   : > { %p1874_p10 = scmp.lt.u32.totalorder %s1872_s23, %s1868_s19  ;;  %p1876_p12 = scmp.lt.u32.totalorder %s1868_s19, %s2370_s14 }
 0x2ec   : > { %p1870_p7 = pnand %p1869_p4, %p1999_p5 }
 0x2ed   : > { %p1875_p11 = por %p1874_p10, %p1873_p9 }
 0x2ee   : > { %p1871_p8 = pneg %p1870_p7 }
 0x2ef   : > { %p1877_p13 = por %p1876_p12, %p1875_p11 }
 0x2f1   : > { %p1878_p0 = pnand %p1877_p13, %p1871_p8 }
 0x2f3   : > { %1881 = shalt.err (!%p1878_p0)
}
 0x2f4   : > { %s1919_s13 = smov 128   ;;  %s1920_s20 = smov 8  }
 0x2f5   : > { %1813 = dma.vmem_to_hbm [thread:$0]  (%p1999_p5), %s2372_s9, 4096, %s2370_s14, %s2379_s28, %s1919_s13, %s1919_s13, %s1920_s20  }
 0x2f6 PF: > { %p1819_p1 = scmp.ge.s32.totalorder %s1916_s27, 2  ;;  %s1270_s15 = sand.u32 1, %s1904_s24  }
 0x2f7   : > { %s1271_s16 = scalar_lea.sflag [#allocation3], %s1270_s15 }
 0x2f8   : > { %p1816_p2 = pnand %p1819_p1, %p2003_p6 }
 0x2fa   : > { %1899 = dma.done.wait (!%p1816_p2), %s1271_s16, 4096  }
 0x2fb   : > { %1901 = vsyncadd (!%p1816_p2), %s1271_s16, 4294963200  ;;  %p17_p3 = scmp.ge.s32.totalorder %s1986_s30, 4   ;;  %s2430_s24 = smov %s1908_s25 }
 0x2fc   : > { %s2431_s25 = smov %s1912_s26  ;;  %s2432_s26 = smov %s1997_s10 }
 0x2fd   : > { %s2433_s27 = smov %s1986_s30  ;;  %19 = sbr.rel (!%p17_p3) target bundleno = 3 (0x3), region = 83 }
 0x304   :  { %1276 = vsyncpa [#allocation3], 1 }
 0x305   :  { %1278 = vsyncpa [#allocation3 + $0x1], 1 }

</bundles_post_ra>
